<compile_context>
chip_gen: v6e
topology: v6e:2x2x1
jax: 0.10.0
libtpu: 0.0.40
codegen_flags: <defaults>
</compile_context>

<pallas_src>
import functools

import jax
import jax.numpy as jnp
from jax.experimental import pallas as pl
from jax.experimental.pallas import tpu as pltpu


def _round_up(x, m):
    return (x + m - 1) // m * m


# ------------------------------------------------------------------
# Fused kernel: online-softmax id loss streamed over class tiles,
# batch-hard triplet loss on grid step 0 (overlapped with the logits
# DMA), DynamicFocalLoss scalar combination in the epilogue.
# ------------------------------------------------------------------
def _dyn_focal_kernel(emb_ref, lab_col_ref, lab_row_ref, logits_ref, out_ref,
                      m_scr, l_scr, zy_scr, tr_scr, *, tc, c_dim, delta_thresh):
    c = pl.program_id(0)
    nc = pl.num_programs(0)

    # ---- grid step 0: init accumulators + full batch-hard triplet loss -----
    # Runs while the next logits tile is being DMA'd, so the MXU gram matmul and
    # the (B, B) selection ride in otherwise-idle slots of the HBM-bound stream.
    @pl.when(c == 0)
    def _():
        m_scr[...] = jnp.full_like(m_scr, -jnp.inf)
        l_scr[...] = jnp.zeros_like(l_scr)
        zy_scr[...] = jnp.zeros_like(zy_scr)

        x = emb_ref[...].astype(jnp.float32)                       # (B, D)
        lab_col = lab_col_ref[...]                                 # (B, 1) int32
        lab_row = lab_row_ref[...]                                 # (1, B) int32
        sq = jnp.sum(x * x, axis=-1, keepdims=True)                # (B, 1)
        gram = jax.lax.dot_general(                                # (B, B) on the MXU
            x, x, (((1,), (1,)), ((), ())),
            preferred_element_type=jnp.float32)
        d2 = jnp.maximum(sq + jnp.transpose(sq) - 2.0 * gram, 0.0)

        same = lab_col == lab_row                                  # (B, B)
        big = jnp.float32(1e30)
        # diagonal of clamped d2 is ~0 -> cannot win the max; no not_diag mask needed
        pos_d2 = jnp.max(jnp.where(same, d2, 0.0), axis=-1, keepdims=True)
        neg_d2 = jnp.min(jnp.where(same, big, d2), axis=-1, keepdims=True)
        hard_pos = jnp.sqrt(pos_d2 + 1e-12)                        # only 2B sqrts total
        hard_neg = jnp.sqrt(neg_d2 + 1e-12)

        # TODO(synk): anchors with no same-class positive still contribute
        #             softplus(-hard_neg); some batch-hard variants exclude them.
        per_anchor = jax.nn.softplus(hard_pos - hard_neg)          # (B, 1)
        tr_scr[0] = jnp.mean(per_anchor)                           # loss_tr
        tr_scr[1] = jnp.mean(jnp.square(1.0 - jnp.exp(-per_anchor)))  # fl_tr

    # ---- online softmax over this (B, tc) class tile ------------------------
    z = logits_ref[...].astype(jnp.float32)                        # (B, tc)
    lab_col = lab_col_ref[...]                                     # (B, 1) int32
    col = c * tc + jax.lax.broadcasted_iota(jnp.int32, z.shape, 1)
    if c_dim % tc != 0:   # static: only mask the OOB tail when classes don't tile evenly
        z = jnp.where(col < c_dim, z, -jnp.inf)
    label_mask = col == lab_col                                    # one-hot, never OOB

    m_old = m_scr[...]
    m_new = jnp.maximum(m_old, jnp.max(z, axis=-1, keepdims=True))
    alpha = jnp.exp(m_old - m_new)
    l_scr[...] = alpha * l_scr[...] + jnp.sum(jnp.exp(z - m_new),
                                              axis=-1, keepdims=True)
    zy_scr[...] = zy_scr[...] + jnp.sum(jnp.where(label_mask, z, 0.0),
                                        axis=-1, keepdims=True)
    m_scr[...] = m_new

    # ---- epilogue: finalize id loss, combine with stashed triplet scalars ---
    @pl.when(c == nc - 1)
    def _():
        log_z = m_scr[...] + jnp.log(l_scr[...])                   # (B, 1) logsumexp
        zy = zy_scr[...]                                           # (B, 1) logit @ label
        ce = log_z - zy                                            # -log p_y
        p_t = jnp.exp(zy - log_z)
        loss_id = jnp.mean(ce)
        fl_id = jnp.mean(jnp.square(1.0 - p_t))

        loss_tr = tr_scr[0]
        fl_tr = tr_scr[1]

        # DynamicFocalLossModule.forward scalar combination
        # TODO(synk): reference uses exact `fl_id == 0.0`; kept exact for parity.
        is_zero = fl_id == 0.0
        safe_fl_id = jnp.where(is_zero, 1.0, fl_id)
        delta = jnp.where(is_zero, jnp.float32(999.0), fl_tr / safe_fl_id)
        combined = fl_tr * loss_tr + fl_id * loss_id
        out_ref[0, 0] = jnp.where(delta < delta_thresh, loss_id, combined)


# ------------------------------------------------------------------
# Wrapper
# ------------------------------------------------------------------
def dynamic_focal_loss(embeddings, labels, logits, *, delta, class_tile=2048):
    b, d = embeddings.shape
    _, c_dim = logits.shape

    labels = labels.astype(jnp.int32)
    lab_col = labels.reshape(b, 1)
    lab_row = labels.reshape(1, b)

    # Lane-dense class tile (multiple of 128).  No wrapper-side padding of logits:
    # a possibly-partial last tile is masked inside the kernel.
    tc = int(min(class_tile, _round_up(c_dim, 128)))
    n_tiles = pl.cdiv(c_dim, tc)

    # VMEM budget: resident embeddings + double-buffered logits tiles + the (B, B)
    # gram/d2/mask temporaries of the triplet step + small accumulators, with 2x
    # headroom, capped at 56 MiB (keeps Mosaic-internal headroom on v7x's 64 MiB).
    est = 4 * (b * d + 2 * b * tc + 4 * b * b + 16 * b)
    vmem_limit = int(min(56 << 20, max(32 << 20, 2 * est)))

    kernel = functools.partial(_dyn_focal_kernel, tc=tc, c_dim=int(c_dim),
                               delta_thresh=float(delta))

    grid_spec = pltpu.PrefetchScalarGridSpec(
        num_scalar_prefetch=0,
        grid=(n_tiles,),
        in_specs=[
            pl.BlockSpec((b, d), lambda c: (0, 0)),      # embeddings (resident)
            pl.BlockSpec((b, 1), lambda c: (0, 0)),      # labels as column
            pl.BlockSpec((1, b), lambda c: (0, 0)),      # labels as row
            pl.BlockSpec((b, tc), lambda c: (0, c)),     # logits class tiles (streamed)
        ],
        out_specs=pl.BlockSpec((1, 1), lambda c: (0, 0),
                               memory_space=pltpu.MemorySpace.SMEM),
        scratch_shapes=[
            pltpu.VMEM((b, 1), jnp.float32),             # running max
            pltpu.VMEM((b, 1), jnp.float32),             # running sum
            pltpu.VMEM((b, 1), jnp.float32),             # logit at label
            pltpu.SMEM((2,), jnp.float32),               # (loss_tr, fl_tr)
        ],
    )

    out = pl.pallas_call(
        kernel,
        out_shape=jax.ShapeDtypeStruct((1, 1), jnp.float32),
        grid_spec=grid_spec,
        compiler_params=pltpu.CompilerParams(
            dimension_semantics=("arbitrary",),          # class axis is a reduction
            vmem_limit_bytes=vmem_limit,
        ),
    )(embeddings, lab_col, lab_row, logits)
    return out[0, 0]


class DynamicFocalLossModule:
    """JAX/Pallas port of DynamicFocalLossModule.forward (single fused kernel)."""

    def __init__(self, delta):
        self.delta = float(delta)

    def __call__(self, embeddings, labels, logits):
        return dynamic_focal_loss(embeddings, labels, logits, delta=self.delta)


if __name__ == "__main__":
    key = jax.random.PRNGKey(0)
    k_emb, k_lab, k_w = jax.random.split(key, 3)

    # Small, lane-aligned shapes (B multiple of 8, D/C multiples of 128).
    # class_tile=128 with C=256 forces a 2-tile streamed grid so the online-softmax
    # accumulation path (not just the single-tile epilogue) is exercised.
    B, D, C = 8, 128, 256
    embeddings = jax.random.normal(k_emb, (B, D), dtype=jnp.float32)
    labels = jax.random.randint(k_lab, (B,), 0, 4, dtype=jnp.int32)
    W = 0.1 * jax.random.normal(k_w, (D, C), dtype=jnp.float32)
    logits = embeddings @ W

    loss = dynamic_focal_loss(embeddings, labels, logits, delta=1.0, class_tile=128)
    jax.block_until_ready(loss)
    print("KERNEL_OK")
</pallas_src>

<mosaic_0001>
module attributes {stable_mosaic.version = 11 : i64} {
  func.func @_dyn_focal_kernel(%arg0: i32, %arg1: memref<8x128xf32, #tpu.memory_space<vmem>>, %arg2: memref<8x1xi32, #tpu.memory_space<vmem>>, %arg3: memref<1x8xi32, #tpu.memory_space<vmem>>, %arg4: memref<8x128xf32, #tpu.memory_space<vmem>>, %arg5: memref<1x1xf32, #tpu.memory_space<smem>>, %arg6: memref<8x1xf32, #tpu.memory_space<vmem>>, %arg7: memref<8x1xf32, #tpu.memory_space<vmem>>, %arg8: memref<8x1xf32, #tpu.memory_space<vmem>>, %arg9: memref<2xf32, #tpu.memory_space<smem>>) attributes {dimension_semantics = [#tpu.dimension_semantics<arbitrary>], iteration_bounds = array<i64: 2>, scalar_prefetch = 0 : i64, scratch_operands = 4 : i64, tpu.core_type = #tpu.core_type<tc>, window_params = [{pipeline_mode = #tpu.pipeline_mode<synchronous>, transform_indices = @transform_0, window_bounds = array<i64: 8, 128>}, {pipeline_mode = #tpu.pipeline_mode<synchronous>, transform_indices = @transform_1, window_bounds = array<i64: 8, 1>}, {pipeline_mode = #tpu.pipeline_mode<synchronous>, transform_indices = @transform_2, window_bounds = array<i64: 1, 8>}, {transform_indices = @transform_3, window_bounds = array<i64: 8, 128>}, {transform_indices = @transform_4, window_bounds = array<i64: 1, 1>}]} {
    %c0_i32 = arith.constant 0 : i32
    %0 = arith.cmpi eq, %arg0, %c0_i32 : i32
    %1 = arith.extui %0 : i1 to i32
    %c0_i32_0 = arith.constant 0 : i32
    %2 = arith.cmpi ne, %1, %c0_i32_0 : i32
    scf.if %2 {
      %cst_20 = arith.constant 0xFF800000 : f32
      %37 = vector.broadcast %cst_20 : f32 to vector<8x1xf32>
      %c0_21 = arith.constant 0 : index
      %c0_22 = arith.constant 0 : index
      %38 = vector.load %arg6[%c0_21, %c0_22] : memref<8x1xf32, #tpu.memory_space<vmem>>, vector<8x1xf32>
      tpu.vector_store %arg6[%c0_21, %c0_22], %37 {strides = array<i32>} : memref<8x1xf32, #tpu.memory_space<vmem>>, vector<8x1xf32>,
      %cst_23 = arith.constant 0.000000e+00 : f32
      %39 = vector.broadcast %cst_23 : f32 to vector<8x1xf32>
      %c0_24 = arith.constant 0 : index
      %c0_25 = arith.constant 0 : index
      %40 = vector.load %arg7[%c0_24, %c0_25] : memref<8x1xf32, #tpu.memory_space<vmem>>, vector<8x1xf32>
      tpu.vector_store %arg7[%c0_24, %c0_25], %39 {strides = array<i32>} : memref<8x1xf32, #tpu.memory_space<vmem>>, vector<8x1xf32>,
      %cst_26 = arith.constant 0.000000e+00 : f32
      %41 = vector.broadcast %cst_26 : f32 to vector<8x1xf32>
      %c0_27 = arith.constant 0 : index
      %c0_28 = arith.constant 0 : index
      %42 = vector.load %arg8[%c0_27, %c0_28] : memref<8x1xf32, #tpu.memory_space<vmem>>, vector<8x1xf32>
      tpu.vector_store %arg8[%c0_27, %c0_28], %41 {strides = array<i32>} : memref<8x1xf32, #tpu.memory_space<vmem>>, vector<8x1xf32>,
      %c0_29 = arith.constant 0 : index
      %c0_30 = arith.constant 0 : index
      %43 = vector.load %arg1[%c0_29, %c0_30] : memref<8x128xf32, #tpu.memory_space<vmem>>, vector<8x128xf32>
      %c0_31 = arith.constant 0 : index
      %c0_32 = arith.constant 0 : index
      %44 = vector.load %arg2[%c0_31, %c0_32] : memref<8x1xi32, #tpu.memory_space<vmem>>, vector<8x1xi32>
      %c0_33 = arith.constant 0 : index
      %c0_34 = arith.constant 0 : index
      %45 = vector.load %arg3[%c0_33, %c0_34] : memref<1x8xi32, #tpu.memory_space<vmem>>, vector<1x8xi32>
      %46 = arith.mulf %43, %43 : vector<8x128xf32>
      %cst_35 = arith.constant dense<0.000000e+00> : vector<8xf32>
      %47 = vector.multi_reduction <add>, %46, %cst_35 [1] : vector<8x128xf32> to vector<8xf32>
      %48 = vector.shape_cast %47 : vector<8xf32> to vector<8x1xf32>
      %cst_36 = arith.constant dense<0.000000e+00> : vector<8x8xf32>
      %49 = tpu.matmul %43, %43, %cst_36 {dimension_numbers = #tpu.dot_dimension_numbers<[1], [1], [0], [0], [0, 0, 1, 0], [], []>} : vector<8x128xf32>, vector<8x128xf32>, vector<8x8xf32> -> vector<8x8xf32>
      %50 = tpu.transpose %48, [1, 0] : vector<8x1xf32> -> vector<1x8xf32>
      %51 = vector.broadcast %48 : vector<8x1xf32> to vector<8x8xf32>
      %52 = vector.broadcast %50 : vector<1x8xf32> to vector<8x8xf32>
      %53 = arith.addf %51, %52 : vector<8x8xf32>
      %cst_37 = arith.constant 2.000000e+00 : f32
      %54 = vector.broadcast %cst_37 : f32 to vector<8x8xf32>
      %55 = arith.mulf %54, %49 : vector<8x8xf32>
      %56 = arith.subf %53, %55 : vector<8x8xf32>
      %cst_38 = arith.constant 0.000000e+00 : f32
      %57 = vector.broadcast %cst_38 : f32 to vector<8x8xf32>
      %58 = arith.maximumf %56, %57 : vector<8x8xf32>
      %59 = vector.broadcast %44 : vector<8x1xi32> to vector<8x8xi32>
      %60 = vector.broadcast %45 : vector<1x8xi32> to vector<8x8xi32>
      %61 = arith.cmpi eq, %59, %60 : vector<8x8xi32>
      %cst_39 = arith.constant 0.000000e+00 : f32
      %62 = vector.broadcast %cst_39 : f32 to vector<8x8xf32>
      %63 = arith.select %61, %58, %62 : vector<8x8xi1>, vector<8x8xf32>
      %cst_40 = arith.constant dense<0xFF800000> : vector<8xf32>
      %64 = vector.multi_reduction <maximumf>, %63, %cst_40 [1] : vector<8x8xf32> to vector<8xf32>
      %65 = vector.shape_cast %64 : vector<8xf32> to vector<8x1xf32>
      %cst_41 = arith.constant 1.000000e+30 : f32
      %66 = vector.broadcast %cst_41 : f32 to vector<8x8xf32>
      %67 = arith.select %61, %66, %58 : vector<8x8xi1>, vector<8x8xf32>
      %cst_42 = arith.constant dense<0x7F800000> : vector<8xf32>
      %68 = vector.multi_reduction <minimumf>, %67, %cst_42 [1] : vector<8x8xf32> to vector<8xf32>
      %69 = vector.shape_cast %68 : vector<8xf32> to vector<8x1xf32>
      %cst_43 = arith.constant 9.99999996E-13 : f32
      %70 = vector.broadcast %cst_43 : f32 to vector<8x1xf32>
      %71 = arith.addf %65, %70 : vector<8x1xf32>
      %72 = math.sqrt %71 : vector<8x1xf32>
      %cst_44 = arith.constant 9.99999996E-13 : f32
      %73 = vector.broadcast %cst_44 : f32 to vector<8x1xf32>
      %74 = arith.addf %69, %73 : vector<8x1xf32>
      %75 = math.sqrt %74 : vector<8x1xf32>
      %76 = arith.subf %72, %75 : vector<8x1xf32>
      %cst_45 = arith.constant 0.000000e+00 : f32
      %77 = vector.broadcast %cst_45 : f32 to vector<8x1xf32>
      %78 = arith.maximumf %76, %77 : vector<8x1xf32>
      %79 = vector.broadcast %cst_45 : f32 to vector<8x1xf32>
      %80 = arith.subf %76, %79 : vector<8x1xf32>
      %81 = arith.cmpf one, %80, %80 : vector<8x1xf32>
      %82 = vector.broadcast %cst_45 : f32 to vector<8x1xf32>
      %83 = arith.addf %76, %82 : vector<8x1xf32>
      %84 = math.absf %80 : vector<8x1xf32>
      %cst_46 = arith.constant 0.000000e+00 : f32
      %85 = vector.broadcast %cst_46 : f32 to vector<8x1xf32>
      %86 = arith.subf %85, %84 : vector<8x1xf32>
      %87 = math.exp %86 : vector<8x1xf32>
      %88 = math.log1p %87 : vector<8x1xf32>
      %89 = arith.addf %78, %88 : vector<8x1xf32>
      %90 = arith.select %81, %83, %89 : vector<8x1xi1>, vector<8x1xf32>
      %91 = vector.shape_cast %90 : vector<8x1xf32> to vector<1x8x1xf32>
      %cst_47 = arith.constant dense<0.000000e+00> : vector<1xf32>
      %92 = vector.multi_reduction <add>, %91, %cst_47 [1, 2] : vector<1x8x1xf32> to vector<1xf32>
      %93 = vector.shape_cast %92 : vector<1xf32> to vector<1x1x1xf32>
      %94 = vector.extract %93[0, 0, 0] : f32 from vector<1x1x1xf32>
      %cst_48 = arith.constant 8.000000e+00 : f32
      %95 = arith.divf %94, %cst_48 : f32
      %c0_49 = arith.constant 0 : index
      %96 = memref.load %arg9[%c0_49] : memref<2xf32, #tpu.memory_space<smem>>
      memref.store %95, %arg9[%c0_49] : memref<2xf32, #tpu.memory_space<smem>>
      %cst_50 = arith.constant 0.000000e+00 : f32
      %97 = vector.broadcast %cst_50 : f32 to vector<8x1xf32>
      %98 = arith.subf %97, %90 : vector<8x1xf32>
      %99 = math.exp %98 : vector<8x1xf32>
      %cst_51 = arith.constant 1.000000e+00 : f32
      %100 = vector.broadcast %cst_51 : f32 to vector<8x1xf32>
      %101 = arith.subf %100, %99 : vector<8x1xf32>
      %102 = arith.mulf %101, %101 : vector<8x1xf32>
      %103 = vector.shape_cast %102 : vector<8x1xf32> to vector<1x8x1xf32>
      %cst_52 = arith.constant dense<0.000000e+00> : vector<1xf32>
      %104 = vector.multi_reduction <add>, %103, %cst_52 [1, 2] : vector<1x8x1xf32> to vector<1xf32>
      %105 = vector.shape_cast %104 : vector<1xf32> to vector<1x1x1xf32>
      %106 = vector.extract %105[0, 0, 0] : f32 from vector<1x1x1xf32>
      %cst_53 = arith.constant 8.000000e+00 : f32
      %107 = arith.divf %106, %cst_53 : f32
      %c1 = arith.constant 1 : index
      %108 = memref.load %arg9[%c1] : memref<2xf32, #tpu.memory_space<smem>>
      memref.store %107, %arg9[%c1] : memref<2xf32, #tpu.memory_space<smem>>
    } else {
    }
    %c0 = arith.constant 0 : index
    %c0_1 = arith.constant 0 : index
    %3 = vector.load %arg4[%c0, %c0_1] : memref<8x128xf32, #tpu.memory_space<vmem>>, vector<8x128xf32>
    %c0_2 = arith.constant 0 : index
    %c0_3 = arith.constant 0 : index
    %4 = vector.load %arg2[%c0_2, %c0_3] : memref<8x1xi32, #tpu.memory_space<vmem>>, vector<8x1xi32>
    %c128_i32 = arith.constant 128 : i32
    %5 = arith.muli %arg0, %c128_i32 : i32
    %6 = tpu.iota {dimensions = array<i32: 1>} : vector<8x128xi32>
    %7 = vector.broadcast %5 : i32 to vector<8x128xi32>
    %8 = arith.addi %7, %6 : vector<8x128xi32>
    %9 = vector.broadcast %4 : vector<8x1xi32> to vector<8x128xi32>
    %10 = arith.cmpi eq, %8, %9 : vector<8x128xi32>
    %c0_4 = arith.constant 0 : index
    %c0_5 = arith.constant 0 : index
    %11 = vector.load %arg6[%c0_4, %c0_5] : memref<8x1xf32, #tpu.memory_space<vmem>>, vector<8x1xf32>
    %cst = arith.constant dense<0xFF800000> : vector<8xf32>
    %12 = vector.multi_reduction <maximumf>, %3, %cst [1] : vector<8x128xf32> to vector<8xf32>
    %13 = vector.shape_cast %12 : vector<8xf32> to vector<8x1xf32>
    %14 = arith.maximumf %11, %13 : vector<8x1xf32>
    %15 = arith.subf %11, %14 : vector<8x1xf32>
    %16 = math.exp %15 : vector<8x1xf32>
    %c0_6 = arith.constant 0 : index
    %c0_7 = arith.constant 0 : index
    %17 = vector.load %arg7[%c0_6, %c0_7] : memref<8x1xf32, #tpu.memory_space<vmem>>, vector<8x1xf32>
    %18 = arith.mulf %16, %17 : vector<8x1xf32>
    %19 = vector.broadcast %14 : vector<8x1xf32> to vector<8x128xf32>
    %20 = arith.subf %3, %19 : vector<8x128xf32>
    %21 = math.exp %20 : vector<8x128xf32>
    %cst_8 = arith.constant dense<0.000000e+00> : vector<8xf32>
    %22 = vector.multi_reduction <add>, %21, %cst_8 [1] : vector<8x128xf32> to vector<8xf32>
    %23 = vector.shape_cast %22 : vector<8xf32> to vector<8x1xf32>
    %24 = arith.addf %18, %23 : vector<8x1xf32>
    %c0_9 = arith.constant 0 : index
    %c0_10 = arith.constant 0 : index
    %25 = vector.load %arg7[%c0_9, %c0_10] : memref<8x1xf32, #tpu.memory_space<vmem>>, vector<8x1xf32>
    tpu.vector_store %arg7[%c0_9, %c0_10], %24 {strides = array<i32>} : memref<8x1xf32, #tpu.memory_space<vmem>>, vector<8x1xf32>,
    %c0_11 = arith.constant 0 : index
    %c0_12 = arith.constant 0 : index
    %26 = vector.load %arg8[%c0_11, %c0_12] : memref<8x1xf32, #tpu.memory_space<vmem>>, vector<8x1xf32>
    %cst_13 = arith.constant 0.000000e+00 : f32
    %27 = vector.broadcast %cst_13 : f32 to vector<8x128xf32>
    %28 = arith.select %10, %3, %27 : vector<8x128xi1>, vector<8x128xf32>
    %cst_14 = arith.constant dense<0.000000e+00> : vector<8xf32>
    %29 = vector.multi_reduction <add>, %28, %cst_14 [1] : vector<8x128xf32> to vector<8xf32>
    %30 = vector.shape_cast %29 : vector<8xf32> to vector<8x1xf32>
    %31 = arith.addf %26, %30 : vector<8x1xf32>
    %c0_15 = arith.constant 0 : index
    %c0_16 = arith.constant 0 : index
    %32 = vector.load %arg8[%c0_15, %c0_16] : memref<8x1xf32, #tpu.memory_space<vmem>>, vector<8x1xf32>
    tpu.vector_store %arg8[%c0_15, %c0_16], %31 {strides = array<i32>} : memref<8x1xf32, #tpu.memory_space<vmem>>, vector<8x1xf32>,
    %c0_17 = arith.constant 0 : index
    %c0_18 = arith.constant 0 : index
    %33 = vector.load %arg6[%c0_17, %c0_18] : memref<8x1xf32, #tpu.memory_space<vmem>>, vector<8x1xf32>
    tpu.vector_store %arg6[%c0_17, %c0_18], %14 {strides = array<i32>} : memref<8x1xf32, #tpu.memory_space<vmem>>, vector<8x1xf32>,
    %c1_i32 = arith.constant 1 : i32
    %34 = arith.cmpi eq, %arg0, %c1_i32 : i32
    %35 = arith.extui %34 : i1 to i32
    %c0_i32_19 = arith.constant 0 : i32
    %36 = arith.cmpi ne, %35, %c0_i32_19 : i32
    scf.if %36 {
      %c0_20 = arith.constant 0 : index
      %c0_21 = arith.constant 0 : index
      %37 = vector.load %arg6[%c0_20, %c0_21] : memref<8x1xf32, #tpu.memory_space<vmem>>, vector<8x1xf32>
      %c0_22 = arith.constant 0 : index
      %c0_23 = arith.constant 0 : index
      %38 = vector.load %arg7[%c0_22, %c0_23] : memref<8x1xf32, #tpu.memory_space<vmem>>, vector<8x1xf32>
      %39 = math.log %38 : vector<8x1xf32>
      %40 = arith.addf %37, %39 : vector<8x1xf32>
      %c0_24 = arith.constant 0 : index
      %c0_25 = arith.constant 0 : index
      %41 = vector.load %arg8[%c0_24, %c0_25] : memref<8x1xf32, #tpu.memory_space<vmem>>, vector<8x1xf32>
      %42 = arith.subf %40, %41 : vector<8x1xf32>
      %43 = arith.subf %41, %40 : vector<8x1xf32>
      %44 = math.exp %43 : vector<8x1xf32>
      %45 = vector.shape_cast %42 : vector<8x1xf32> to vector<1x8x1xf32>
      %cst_26 = arith.constant dense<0.000000e+00> : vector<1xf32>
      %46 = vector.multi_reduction <add>, %45, %cst_26 [1, 2] : vector<1x8x1xf32> to vector<1xf32>
      %47 = vector.shape_cast %46 : vector<1xf32> to vector<1x1x1xf32>
      %48 = vector.extract %47[0, 0, 0] : f32 from vector<1x1x1xf32>
      %cst_27 = arith.constant 8.000000e+00 : f32
      %49 = arith.divf %48, %cst_27 : f32
      %cst_28 = arith.constant 1.000000e+00 : f32
      %50 = vector.broadcast %cst_28 : f32 to vector<8x1xf32>
      %51 = arith.subf %50, %44 : vector<8x1xf32>
      %52 = arith.mulf %51, %51 : vector<8x1xf32>
      %53 = vector.shape_cast %52 : vector<8x1xf32> to vector<1x8x1xf32>
      %cst_29 = arith.constant dense<0.000000e+00> : vector<1xf32>
      %54 = vector.multi_reduction <add>, %53, %cst_29 [1, 2] : vector<1x8x1xf32> to vector<1xf32>
      %55 = vector.shape_cast %54 : vector<1xf32> to vector<1x1x1xf32>
      %56 = vector.extract %55[0, 0, 0] : f32 from vector<1x1x1xf32>
      %cst_30 = arith.constant 8.000000e+00 : f32
      %57 = arith.divf %56, %cst_30 : f32
      %c0_31 = arith.constant 0 : index
      %58 = memref.load %arg9[%c0_31] : memref<2xf32, #tpu.memory_space<smem>>
      %c1 = arith.constant 1 : index
      %59 = memref.load %arg9[%c1] : memref<2xf32, #tpu.memory_space<smem>>
      %cst_32 = arith.constant 0.000000e+00 : f32
      %60 = arith.cmpf oeq, %57, %cst_32 : f32
      %cst_33 = arith.constant 1.000000e+00 : f32
      %61 = arith.select %60, %cst_33, %57 : f32
      %62 = arith.divf %59, %61 : f32
      %cst_34 = arith.constant 9.990000e+02 : f32
      %63 = arith.select %60, %cst_34, %62 : f32
      %64 = arith.mulf %59, %58 : f32
      %65 = arith.mulf %57, %49 : f32
      %66 = arith.addf %64, %65 : f32
      %cst_35 = arith.constant 1.000000e+00 : f32
      %67 = arith.cmpf olt, %63, %cst_35 : f32
      %68 = arith.select %67, %49, %66 : f32
      %c0_36 = arith.constant 0 : index
      %c0_37 = arith.constant 0 : index
      %69 = memref.load %arg5[%c0_36, %c0_37] : memref<1x1xf32, #tpu.memory_space<smem>>
      memref.store %68, %arg5[%c0_36, %c0_37] : memref<1x1xf32, #tpu.memory_space<smem>>
    } else {
    }
    return
  }
  func.func @transform_0(%arg0: i32) -> (i32, i32) {
    %c0_i32 = arith.constant 0 : i32
    %c0_i32_0 = arith.constant 0 : i32
    %c0_i32_1 = arith.constant 0 : i32
    return %c0_i32, %c0_i32_0 : i32, i32
  }
  func.func @transform_1(%arg0: i32) -> (i32, i32) {
    %c0_i32 = arith.constant 0 : i32
    %c0_i32_0 = arith.constant 0 : i32
    %c0_i32_1 = arith.constant 0 : i32
    return %c0_i32, %c0_i32_0 : i32, i32
  }
  func.func @transform_2(%arg0: i32) -> (i32, i32) {
    %c0_i32 = arith.constant 0 : i32
    %c0_i32_0 = arith.constant 0 : i32
    %c0_i32_1 = arith.constant 0 : i32
    return %c0_i32, %c0_i32_0 : i32, i32
  }
  func.func @transform_3(%arg0: i32) -> (i32, i32) {
    %c0_i32 = arith.constant 0 : i32
    %c0_i32_0 = arith.constant 0 : i32
    return %c0_i32, %arg0 : i32, i32
  }
  func.func @transform_4(%arg0: i32) -> (i32, i32) {
    %c0_i32 = arith.constant 0 : i32
    %c0_i32_0 = arith.constant 0 : i32
    %c0_i32_1 = arith.constant 0 : i32
    return %c0_i32, %c0_i32_0 : i32, i32
  }
}

</mosaic_0001>

<bundles_post_ra>
// kernel: tpu_custom_call.1
= control target key start
LH: loop header
LB: loop body
LE: loop exit
PB: predicated region body
PF: predicated region fallthrough
CT: control target
= control target key end

     0   :  { %9 = vsyncpa [#allocation7], 0  ;;  %s912_s0 = inlined_call_operand.vmem [shape: f32[8,128], index: 0, kind: input, shape index: {}]   ;;  %s913_s1 = inlined_call_operand.vmem [shape: s32[8,1], index: 1, kind: input, shape index: {}]   ;;  %s914_s2 = inlined_call_operand.vmem [shape: s32[1,8], index: 2, kind: input, shape index: {}]   ;;  %s915_s3 = inlined_call_operand.hbm [shape: f32[8,256], index: 3, kind: input, shape index: {}]   ;;  %s916_s4 = inlined_call_operand.hbm [shape: f32[1,1], index: 4, kind: output, shape index: {}]  }
   0x1   :  { %11 = vsyncpa [#allocation7 + $0x1], 0 }
   0x2   :  { %12 = vsyncpa [#allocation8], 0  ;;  %s783_s15 = smov 0   ;;  %s785_s16 = smov 0  }
   0x3   :  { %s787_s17 = smov 0   ;;  %s789_s18 = smov 0  }
   0x4 LB: > { %s802_s19 = sadd.s32 4294967295, %s749_s18   ;;  %s805_s20 = sadd.s32 1, %s749_s18   ;;  %s749_s18 = sphi %s789_s18, %s926_s18   ;;  %s745_s17 = sphi %s787_s17, %s925_s17   ;;  %s741_s16 = sphi %s785_s16, %s924_s16   ;;  %s737_s15 = sphi %s783_s15, %s923_s15  }
   0x5   : > { %s85_s21 = ssub.s32 %s749_s18, %s805_s20  ;;  %s88_s22 = sadd.s32 1, %s745_s17 }
   0x6   : > { %p86_p0 = scmp.eq.s32.totalorder %s85_s21, 0  ;;  %p95_p1 = scmp.ne.s32.totalorder %s745_s17, %s741_s16 }
   0x7   : > { %p96_p2 = scmp.eq.s32.totalorder %s749_s18, 0  ;;  %p101_p3 = scmp.ne.s32.totalorder %s741_s16, %s737_s15 }
   0x8   : > { %s815_s23 = scalar_select %p86_p0, %s745_s17, %s88_s22  }
   0x9   : > { %p97_p4 = por %p96_p2, %p95_p1  ;;  %p102_p5 = scmp.eq.s32.totalorder %s802_s19, 0 }
   0xa   : > { %p609_p6 = scmp.lt.s32.totalorder %s749_s18, 2  ;;  %s155_s25 = sand.u32 1, %s745_s17  }
   0xb   : > { %p819_p7 = por %p102_p5, %p101_p3  ;;  %s569_s26 = sshll.u32 %s155_s25, 3 }
   0xc   : > { %s570_s27 = sshll.u32 %s749_s18, 7  ;;  %s159_s5 = scalar_lea.vmem [#allocation6], %s569_s26 }
   0xd   : > { %s918_s24 = scalar_select %p819_p7, 1, 0 }
   0xe   : > { %s828_s30 = scalar_lea.hbm %s915_s3, %s570_s27  ;;  %s166_s6 = sshll.u32 %s159_s5, 4  ;;  %s830_s6 = int_to_ptr.vmem [resolvable:$true] %s166_s6 }
   0xf   : > { %p832_p8 = pnand %p609_p6, %p97_p4  ;;  %s156_s8 = scalar_lea.sflag [#allocation7], %s155_s25 }
  0x10   : > { %s673_s9 = scalar_lea.hbm %s828_s30, 128  ;;  %s678_s12 = scalar_lea.hbm %s915_s3, 256 }
  0x11   : > { %p674_p11 = scmp.ne.s32.totalorder %s828_s30, %s673_s9  ;;  %p675_p12 = pneg %p832_p8 }
  0x12   : > { %p679_p1 = scmp.lt.s32.totalorder %s828_s30, %s915_s3  ;;  %p680_p2 = scmp.lt.s32.totalorder %s678_s12, %s673_s9 }
  0x13   : > { %p676_p13 = pnand %p675_p12, %p674_p11 }
  0x14   : > { %p681_p3 = por %p680_p2, %p679_p1 }
  0x15   : > { %p677_p0 = pneg %p676_p13 }
  0x17   : > { %p682_p4 = pnand %p681_p3, %p677_p0 }
  0x19   : > { %685 = shalt.err (!%p682_p4)
}
  0x1a   : > { %s686_s15 = scalar_lea.vmem %s830_s6, 128  ;;  %s751_s21 = smov [#allocation6]  }
  0x1b   : > { %p687_p5 = scmp.ne.s32.totalorder %s830_s6, %s686_s15  ;;  %s691_s22 = sshll.u32 %s751_s21, 4  ;;  %s692_s22 = int_to_ptr.vmem [resolvable:$false] %s691_s22 }
  0x1c   : > { %s693_s25 = scalar_lea.vmem %s692_s22, 256  ;;  %p694_p13 = scmp.lt.s32.totalorder %s830_s6, %s692_s22 }
  0x1d   : > { %p689_p6 = pnand %p687_p5, %p675_p12  ;;  %p695_p9 = scmp.lt.s32.totalorder %s693_s25, %s686_s15 }
  0x1f   : > { %p690_p11 = pneg %p689_p6  ;;  %p696_p10 = por %p695_p9, %p694_p13 }
  0x21   : > { %p697_p7 = pnand %p696_p10, %p690_p11 }
  0x23   : > { %700 = shalt.err (!%p697_p7)
}
  0x24   : > { %608 = dma.hbm_to_vmem [thread:$0]  (!%p832_p8), %s828_s30, 128, %s830_s6, %s156_s8  }
  0x25   : > { %p920_p0 = scmp.lt.s32.totalorder %s749_s18, 3  ;;  %p921_p1 = scmp.ge.s32.totalorder %s749_s18, 1 }
  0x27   : > { %p172_p12 = pnand %p921_p1, %p920_p0 }
  0x28   : > { %s177_s26 = sand.u32 (!%p172_p12), 1, %s741_s16   ;;  %p922_p7 = scmp.ne.s32.totalorder (!%p172_p12), %s918_s24, 0 }
  0x29   : > { %175 = sbr.rel (%p172_p12) target bundleno = 1517 (0x5ed), region = 36  ;;  %s861_s27 = sshll.u32 (!%p172_p12), %s177_s26, 3 }
  0x2a   : > { %s178_s28 = scalar_lea.sflag (!%p172_p12), [#allocation7], %s177_s26  ;;  %s181_s29 = scalar_lea.vmem (!%p172_p12), [#allocation6], %s861_s27 }
  0x2e   : > { %728 = dma.done.wait (%p922_p7), %s178_s28, 128  }
  0x2f   : > { %730 = vsyncadd (%p922_p7), %s178_s28, 4294967168  ;;  %p573_p9 = scmp.ne.s32.totalorder %s802_s19, 0 }
  0x31   : > { %204 = sbr.rel (%p573_p9) target bundleno = 762 (0x2fa), region = 44 }
  0x36   : > { %v209_v0 = vld [vmem:[%s912_s0] sm:$0xff]  ;;  %v752_v2 = vmov 0.0   ;;  %vm753_vm0 = vmmov 0   ;;  %v754_v3 = vmov 0   ;;  %v317_v8 = vlaneseq }
  0x37   : > { %v212_v1 = vmul.f32 %v209_v0, %v209_v0  ;;  %584 = vmatprep.subr.mxu0 %v752_v2  ;;  %586 = vmatprep.mubr.msk.f32.mxu0 %vm753_vm0, %v752_v2  ;;  %v210_v4 = vld [vmem:[%s913_s1] sm:$0xff]  ;;  %vm334_vm2 = vcmask 64512   ;;  %vm205_vm3 = vcmask 7168   ;;  %v755_v23 = vmov -inf  }
  0x38   : > { %585 = vmatpush3.xpose.msra.mxu0 %v209_v0  ;;  %650 = vset.pattern.permute.xlu0 %v754_v3  ;;  %v318_v9 = vshrl.u32 %v317_v8, 7  ;;  %v574_v15 = vld [vmem:[%s914_s2] ss:$0 sm:$0xff]  ;;  %206 = vst.msk [vmem:[#allocation2] sm:$0xff] %vm205_vm3, %v755_v23  ;;  %207 = vst.msk [vmem:[#allocation3] sm:$0xff] %vm205_vm3, %v752_v2 }
  0x39   : > { %213 = vadd.xlane.f32.xlu0 %v212_v1  ;;  %208 = vst.msk [vmem:[#allocation4] sm:$0xff] %vm205_vm3, %v752_v2 }
  0x3a   : > { %v319_v10 = vsub.s32 0, %v318_v9 }
  0x3b   : > { %587 = vmatmul.mubr.f32.vlgmr.msra.gmra.mxu0 %v209_v0 }
  0x4f   : > { %326 = vperm.xlu0 %650, %v210_v4  }
  0xc2   : > { %v214_v5 = vpop.xlane.xlu0 %213 }
  0xc3   : > { %285 = vxpose.xlu1.b32.start.end [1/1] (short) (narrow) %v214_v5, 8 }
  0xca   : > { %v327_v16 = vpop.permute.xlu0 %326 }
  0xcb   : > { %vm332_vm1 = vcmp.eq.s32.totalorder %v327_v16, %v574_v15 }
  0xfb   : > { %v281_v6 = vpop.f32.mrf.mxu0 }
  0xfc   : > { %v322_v13 = vmul.f32 2.0, %v281_v6 }
  0xfd   : > { %v588_v7 = vpop.f32.mrf.mxu0 }
 0x13f   : > { %v301_v11 = vpop.trf.xlu1 }
 0x140   : > { %v320_v12 = vrot.slane %v301_v11, %v319_v10 }
 0x142   : > { %v321_v14 = vadd.f32 %v320_v12, %v214_v5 }
 0x144   : > { %v323_v17 = vsub.f32 %v321_v14, %v322_v13 }
 0x146   : > { %v324_v18 = vmax.f32 %v323_v17, 0.0 }
 0x148   : > { %v333_v19 = vsel %vm332_vm1, %v324_v18, 0.0  ;;  %v338_v21 = vsel %vm332_vm1, 1e+30, %v324_v18 }
 0x149   : > { %v335_v20 = vsel %vm334_vm2, %v333_v19, -inf  ;;  %v339_v22 = vsel %vm334_vm2, %v338_v21, inf }
 0x14a   : > { %336 = vmax.xlane.f32.xlu1 %v335_v20 }
 0x14e   : > { %340 = vmin.xlane.f32.xlu1 %v339_v22 }
 0x1d3   : > { %v337_v24 = vpop.xlane.xlu1 %336 }
 0x1d4   : > { %v342_v25 = vadd.f32 1e-12, %v337_v24 }
 0x1d6   : > { %651 = vrsqrt.f32 %v342_v25  ;;  %vm345_vm4 = vcmp.eq.f32.partialorder %v342_v25, inf  ;;  %v348_v33 = vand.u32 2147483648, %v342_v25  ;;  %vm347_vm6 = vcmp.eq.f32.partialorder %v342_v25, 0.0 }
 0x1d7   : > { %v341_v26 = vpop.xlane.xlu1 %340 }
 0x1d8   : > { %v350_v27 = vadd.f32 1e-12, %v341_v26 }
 0x1da   : > { %653 = vrsqrt.f32 %v350_v27  ;;  %vm353_vm5 = vcmp.eq.f32.partialorder %v350_v27, inf  ;;  %v356_v34 = vand.u32 2147483648, %v350_v27  ;;  %vm355_vm7 = vcmp.eq.f32.partialorder %v350_v27, 0.0 }
 0x1e3   : > { %v652_v28 = vpop.eup %651 }
 0x1e4   : > { %v344_v29 = vmul.f32 %v652_v28, %v342_v25 }
 0x1e6   : > { %v346_v31 = vsel %vm345_vm4, %v342_v25, %v344_v29 }
 0x1e7   : > { %v654_v30 = vpop.eup %653  ;;  %v349_v36 = vsel %vm347_vm6, %v348_v33, %v346_v31 }
 0x1e8   : > { %v352_v32 = vmul.f32 %v654_v30, %v350_v27 }
 0x1ea   : > { %v354_v35 = vsel %vm353_vm5, %v350_v27, %v352_v32 }
 0x1eb   : > { %v357_v37 = vsel %vm355_vm7, %v356_v34, %v354_v35 }
 0x1ec   : > { %v358_v38 = vsub.f32 %v349_v36, %v357_v37 }
 0x1ee   : > { %v362_v39 = vand.u32 2147483647, %v358_v38  ;;  %v359_v50 = vmax.f32 %v358_v38, 0.0  ;;  %vm360_vm9 = vcmp.ne.f32.partialorder %v358_v38, %v358_v38 }
 0x1f0   : > { %v363_v40 = vsub.f32 0.0, %v362_v39 }
 0x1f2   : > { %v364_v41 = vmul.f32 1.442695, %v363_v40 }
 0x1f4   : > { %655 = vpow2.f32 %v364_v41 }
 0x201   : > { %v656_v42 = vpop.eup %655 }
 0x202   : > { %v366_v43 = vadd.f32 1.0, %v656_v42  ;;  %v369_v44 = vmul.f32 -0.5, %v656_v42  ;;  %v372_v46 = vand.u32 2147483647, %v656_v42 }
 0x204   : > { %657 = vlog2.f32 %v366_v43  ;;  %v370_v45 = vadd.f32 1.0, %v369_v44  ;;  %vm373_vm8 = vcmp.lt.f32.partialorder %v372_v46, 0.0004427343 }
 0x206   : > { %v371_v49 = vmul.f32 %v656_v42, %v370_v45 }
 0x211   : > { %v658_v47 = vpop.eup %657 }
 0x212   : > { %v368_v48 = vmul.f32 0.6931472, %v658_v47 }
 0x214   : > { %v374_v51 = vsel %vm373_vm8, %v371_v49, %v368_v48 }
 0x215   : > { %v375_v52 = vadd.f32 %v374_v51, %v359_v50 }
 0x217   : > { %v376_v53 = vsel %vm360_vm9, %v358_v38, %v375_v52 }
 0x218   : > { %v377_v54 = vsel %vm205_vm3, %v376_v53, 0.0  ;;  %v392_v55 = vsub.f32 0.0, %v376_v53 }
 0x219   : > { %378 = vadd.xlane.f32.xlu1 %v377_v54 }
 0x21a   : > { %v393_v56 = vmul.f32 1.442695, %v392_v55 }
 0x21c   : > { %659 = vpow2.f32 %v393_v56 }
 0x229   : > { %v660_v57 = vpop.eup %659 }
 0x22a   : > { %v395_v58 = vsub.f32 1.0, %v660_v57 }
 0x22c   : > { %v396_v59 = vmul.f32 %v395_v58, %v395_v58 }
 0x22e   : > { %v397_v60 = vsel %vm205_vm3, %v396_v59, 0.0 }
 0x22f   : > { %398 = vadd.xlane.f32.xlu0 %v397_v60 }
 0x2a2   : > { %v379_v61 = vpop.xlane.xlu1 %378 }
 0x2a3   : > { %v380_v62 = vrot.slane %v379_v61, 4 }
 0x2a5   : > { %v381_v63 = vadd.f32 %v380_v62, %v379_v61 }
 0x2a7   : > { %v382_v0 = vrot.slane %v381_v63, 2 }
 0x2a9   : > { %v383_v1 = vadd.f32 %v382_v0, %v381_v63 }
 0x2ab   : > { %v384_v2 = vrot.slane %v383_v1, 1 }
 0x2ad   : > { %v385_v3 = vadd.f32 %v384_v2, %v383_v1 }
 0x2af   : > { %589 = vpush %v385_v3 }
 0x2b8   : > { %v399_v4 = vpop.xlane.xlu0 %398 }
 0x2b9   : > { %v400_v5 = vrot.slane %v399_v4, 4 }
 0x2bb   : > { %v401_v6 = vadd.f32 %v400_v5, %v399_v4 }
 0x2bd   : > { %v402_v7 = vrot.slane %v401_v6, 2 }
 0x2bf   : > { %v403_v8 = vadd.f32 %v402_v7, %v401_v6 }
 0x2c1   : > { %v404_v9 = vrot.slane %v403_v8, 1 }
 0x2c3   : > { %v405_v10 = vadd.f32 %v404_v9, %v403_v8 }
 0x2c5   : > { %591 = vpush %v405_v10 }
 0x2e0   : > { %s590_s8 = spop %589 }
 0x2e1   : > { %s389_s9 = smul.f32 0.125, %s590_s8 }
 0x2e3   : > { %391 = sst [smem:[#allocation5]] %s389_s9 }
 0x2f6   : > { %s592_s10 = spop %591 }
 0x2f7   : > { %s409_s11 = smul.f32 0.125, %s592_s10 }
 0x2f9   : > { %411 = sst [smem:[#allocation5 + $0x1]] %s409_s11 }
 0x2fa PF: > { %v412_v11 = vld [vmem:[%s181_s29] sm:$0xff]  ;;  %v756_v12 = vmov 0   ;;  %vm443_vm10 = vcmask 7168   ;;  %v415_v21 = vlaneseq  ;;  %s575_s14 = sshll.u32 %s802_s19, 7  ;;  %v430_v30 = vld [vmem:[#allocation3] sm:$0xff]  ;;  %v445_v34 = vld [vmem:[#allocation4] sm:$0xff] }
 0x2fb   : > { %424 = vmax.xlane.f32.xlu0 %v412_v11  ;;  %662 = vset.pattern.permute.xlu1 %v756_v12  ;;  %v413_v13 = vld [vmem:[%s913_s1] sm:$0xff]  ;;  %v417_v23 = vstv %s575_s14  ;;  %p576_p8 = scmp.ne.s32.totalorder %s802_s19, 1 }
 0x2fc   : > { %661 = vset.pattern.permute.xlu0 %v756_v12  ;;  %420 = vperm.xlu1 %662, %v413_v13   ;;  %v423_v14 = vld [vmem:[#allocation2] sm:$0xff]  ;;  %v416_v22 = vand.u32 127, %v415_v21  ;;  %s494_s27 = sld [smem:[#allocation5]] (!%p576_p8) }
 0x2fd   : > { %s577_s28 = sld [smem:[#allocation5 + $0x1]] (!%p576_p8) }
 0x2fe   : > { %v418_v24 = vadd.s32 %v417_v23, %v416_v22 }
 0x303   : > { %s503_s30 = smul.f32 (!%p576_p8), %s577_s28, %s494_s27 }
 0x377   : > { %v421_v25 = vpop.permute.xlu1 %420 }
 0x378   : > { %vm422_vm11 = vcmp.eq.s32.totalorder %v418_v24, %v421_v25 }
 0x379   : > { %v446_v27 = vsel %vm422_vm11, %v412_v11, 0.0 }
 0x384   : > { %v425_v15 = vpop.xlane.xlu0 %424 }
 0x385   : > { %v426_v16 = vmax.f32 %v423_v14, %v425_v15 }
 0x387   : > { %v427_v17 = vsub.f32 %v423_v14, %v426_v16  ;;  %451 = vst.msk [vmem:[#allocation2] sm:$0xff] %vm443_vm10, %v426_v16  ;;  %434 = vperm.xlu0 %661, %v426_v16  }
 0x389   : > { %v428_v28 = vmul.f32 1.442695, %v427_v17 }
 0x402   : > { %v435_v18 = vpop.permute.xlu0 %434 }
 0x403   : > { %v437_v19 = vsub.f32 %v412_v11, %v435_v18 }
 0x405   : > { %v438_v20 = vmul.f32 1.442695, %v437_v19 }
 0x407   : > { %663 = vpow2.f32 %v438_v20 }
 0x408   : > { %665 = vpow2.f32 %v428_v28 }
 0x414   : > { %v664_v26 = vpop.eup %663 }
 0x415   : > { %440 = vadd.xlane.f32.xlu1 %v664_v26  ;;  %v666_v29 = vpop.eup %665 }
 0x416   : > { %v431_v31 = vmul.f32 %v666_v29, %v430_v30 }
 0x419   : > { %447 = vadd.xlane.f32.xlu1 %v446_v27 }
 0x49e   : > { %v441_v32 = vpop.xlane.xlu1 %440 }
 0x49f   : > { %v442_v33 = vadd.f32 %v441_v32, %v431_v31 }
 0x4a1   : > { %444 = vst.msk [vmem:[#allocation3] sm:$0xff] %vm443_vm10, %v442_v33  ;;  %455 = sbr.rel (%p576_p8) target bundleno = 1511 (0x5e7), region = 48 }
 0x4a2   : > { %v448_v35 = vpop.xlane.xlu1 %447 }
 0x4a3   : > { %v449_v36 = vadd.f32 %v448_v35, %v445_v34 }
 0x4a5   : > { %450 = vst.msk [vmem:[#allocation4] sm:$0xff] %vm443_vm10, %v449_v36 }
 0x4a6   : > { %v456_v39 = vld [vmem:[#allocation2] sm:$0xff] }
 0x4a8   : > { %v457_v37 = vld [vmem:[#allocation3] sm:$0xff] }
 0x4a9   : > { %667 = vlog2.f32 %v457_v37 }
 0x4ac   : > { %v461_v41 = vld [vmem:[#allocation4] sm:$0xff] }
 0x4b6   : > { %v668_v38 = vpop.eup %667 }
 0x4b7   : > { %v459_v40 = vmul.f32 0.6931472, %v668_v38 }
 0x4b9   : > { %v460_v42 = vadd.f32 %v459_v40, %v456_v39 }
 0x4bb   : > { %v462_v43 = vsub.f32 %v460_v42, %v461_v41  ;;  %v463_v44 = vsub.f32 %v461_v41, %v460_v42 }
 0x4bd   : > { %v464_v45 = vmul.f32 1.442695, %v463_v44  ;;  %v466_v46 = vsel %vm443_vm10, %v462_v43, 0.0 }
 0x4be   : > { %467 = vadd.xlane.f32.xlu0 %v466_v46 }
 0x4bf   : > { %669 = vpow2.f32 %v464_v45 }
 0x4cc   : > { %v670_v47 = vpop.eup %669 }
 0x4cd   : > { %v479_v48 = vsub.f32 1.0, %v670_v47 }
 0x4cf   : > { %v480_v49 = vmul.f32 %v479_v48, %v479_v48 }
 0x4d1   : > { %v481_v50 = vsel %vm443_vm10, %v480_v49, 0.0 }
 0x4d2   : > { %482 = vadd.xlane.f32.xlu0 %v481_v50 }
 0x547   : > { %v468_v51 = vpop.xlane.xlu0 %467 }
 0x548   : > { %v469_v52 = vrot.slane %v468_v51, 4 }
 0x54a   : > { %v470_v53 = vadd.f32 %v469_v52, %v468_v51 }
 0x54c   : > { %v471_v54 = vrot.slane %v470_v53, 2 }
 0x54e   : > { %v472_v55 = vadd.f32 %v471_v54, %v470_v53 }
 0x550   : > { %v473_v56 = vrot.slane %v472_v55, 1 }
 0x552   : > { %v474_v57 = vadd.f32 %v473_v56, %v472_v55 }
 0x554   : > { %593 = vpush %v474_v57 }
 0x55b   : > { %v483_v58 = vpop.xlane.xlu0 %482 }
 0x55c   : > { %v484_v59 = vrot.slane %v483_v58, 4 }
 0x55e   : > { %v485_v60 = vadd.f32 %v484_v59, %v483_v58 }
 0x560   : > { %v486_v61 = vrot.slane %v485_v60, 2 }
 0x562   : > { %v487_v62 = vadd.f32 %v486_v61, %v485_v60 }
 0x564   : > { %v488_v63 = vrot.slane %v487_v62, 1 }
 0x566   : > { %v489_v0 = vadd.f32 %v488_v63, %v487_v62 }
 0x568   : > { %595 = vpush %v489_v0 }
 0x585   : > { %s594_s15 = spop %593 }
 0x586   : > { %s478_s21 = smul.f32 0.125, %s594_s15 }
 0x599   : > { %s596_s22 = spop %595 }
 0x59a   : > { %s493_s25 = smul.f32 0.125, %s596_s22 }
 0x59c   : > { %p496_p10 = scmp.eq.f32.partialorder %s493_s25, 0.0  ;;  %s504_s26 = smul.f32 %s493_s25, %s478_s21 }
 0x59e   : > { %s928_s25 = smov (%p496_p10, %s493_s25), 1.0  ;;  %s505_s5 = sadd.f32 %s504_s26, %s503_s30 }
 0x59f   : > { %v498_v1 = vstv %s928_s25 }
 0x5a0   : > { %671 = vrcp.f32 %v498_v1 }
 0x5ad   : > { %v672_v2 = vpop.eup %671 }
 0x5ae   : > { %597 = vpush %v672_v2 }
 0x5df   : > { %s598_s29 = spop %597 }
 0x5e0   : > { %s501_s18 = smul.f32 %s598_s29, %s577_s28 }
 0x5e2   : > { %s930_s18 = smov (%p496_p10, %s501_s18), 999.0 }
 0x5e3   : > { %p506_p2 = scmp.lt.f32.partialorder %s930_s18, 1.0 }
 0x5e5   : > { %s932_s21 = smov (!%p506_p2, %s478_s21), %s505_s5 }
 0x5e6   : > { %509 = sst [smem:[#allocation9]] %s932_s21 }
 0x5e7 PF: > { %p610_p3 = scmp.eq.s32.totalorder %s802_s19, 1  ;;  %s757_s24 = smov [#allocation9]  }
 0x5e9   : > { %602 = dma.smem_to_hbm (%p610_p3), %s757_s24, 16, %s916_s4, [#allocation8]  }
 0x5ea   : > { %732 = dma.done.wait (%p610_p3), [#allocation8], 16  }
 0x5eb   : > { %734 = vsyncadd (%p610_p3), [#allocation8], 4294967280 }
 0x5ec   : > { %523 = sfence }
 0x5ed PF: > { %p15_p4 = scmp.ge.s32.totalorder %s805_s20, 4   ;;  %s923_s15 = smov %s741_s16 }
 0x5ee   : > { %s924_s16 = smov %s745_s17  ;;  %s925_s17 = smov %s815_s23 }
 0x5ef   : > { %s926_s18 = smov %s805_s20  ;;  %17 = sbr.rel (!%p15_p4) target bundleno = 4 (0x4), region = 84 }
 0x5f4   :  { %529 = vsyncpa [#allocation7], 1 }
 0x5f5   :  { %531 = vsyncpa [#allocation7 + $0x1], 1 }
 0x5f6   :  { %532 = vsyncpa [#allocation8], 1 }
 0x5f7   :  { %534 = vsyncpa [#allocation8 + $0x1], 1 }

</bundles_post_ra>
